<compile_context>
chip_gen: v6e
topology: v6e:2x2x1
jax: 0.10.0
libtpu: 0.0.40
codegen_flags: <defaults>
</compile_context>

<pallas_src>
import functools

import jax
import jax.numpy as jnp
from jax.experimental import pallas as pl
from jax.experimental.pallas import tpu as pltpu

NEG_SLOPE = 0.01
BN_EPS = 1e-5


def _round_up(x, m):
    return ((x + m - 1) // m) * m


def _padded_vmem_bytes(shape, dtype):
    """Approximate VMEM footprint of one array: last dim rounded to 128 lanes,
    second-to-last to the dtype's sublane count (f32:8, bf16:16, int8:32)."""
    itemsize = jnp.dtype(dtype).itemsize
    sublane = {4: 8, 2: 16, 1: 32}.get(itemsize, 8)
    if len(shape) == 0:
        return 128 * sublane * itemsize
    if len(shape) == 1:
        return _round_up(shape[0], 128) * sublane * itemsize
    lead = 1
    for d in shape[:-2]:
        lead *= d
    return lead * _round_up(shape[-2], sublane) * _round_up(shape[-1], 128) * itemsize


# ----------------------------------------------------------------------------
# Fused kernel: input layer -> L hidden layers -> output layer + sigmoid.
# All refs are full-array VMEM blocks (no grid).
# ----------------------------------------------------------------------------
def frame_generator_kernel(x_ref, w0_ref, b0_ref, *rest, num_hidden_layers):
    # rest = (wh_ref, bh_ref, wout_ref, bout_ref, o_ref)  if num_hidden_layers > 0
    #      = (wout_ref, bout_ref, o_ref)                  otherwise
    if num_hidden_layers > 0:
        wh_ref, bh_ref, wout_ref, bout_ref, o_ref = rest
    else:
        wh_ref = bh_ref = None
        wout_ref, bout_ref, o_ref = rest

    H = w0_ref.shape[1]

    # ---- first layer ---------------------------------------------------------
    if x_ref.shape[1] == 1:
        # K == 1: broadcast outer product on the VPU, skip the degenerate MXU matmul.
        h = x_ref[...] * w0_ref[...] + b0_ref[...]          # (B,1)*(1,H)+(1,H) -> (B,H)
    else:
        h = jnp.dot(x_ref[...], w0_ref[...],
                    preferred_element_type=jnp.float32) + b0_ref[...]
    h = jnp.maximum(h, NEG_SLOPE * h)                       # LeakyReLU
    # (BatchNorm of this layer is folded into the next layer's weights/bias.)

    # ---- hidden layers: static unrolled, weights live in one lane-dense slab --
    for i in range(num_hidden_layers):
        w_i = wh_ref[:, i * H:(i + 1) * H]                  # (H,H) bf16, static slice
        b_i = bh_ref[:, i * H:(i + 1) * H]                  # (1,H) f32
        h = jnp.dot(h.astype(w_i.dtype), w_i,
                    preferred_element_type=jnp.float32) + b_i
        h = jnp.maximum(h, NEG_SLOPE * h)

    # ---- output layer + sigmoid (last BN folded into wout/bout) ---------------
    z = jnp.dot(h.astype(wout_ref.dtype), wout_ref[...],
                preferred_element_type=jnp.float32) + bout_ref[...]
    o_ref[...] = jax.nn.sigmoid(z)


def frame_generator_forward(x, params, output_size, num_hidden_layers):
    """x: (B, input_size) f32 -> (B, out_h, out_w) f32 (eval-mode forward)."""
    B = x.shape[0]
    H = params["w0"].shape[1]
    P = output_size[0] * output_size[1]
    P_pad = params["w_out"].shape[1]          # lane-padded in make_params
    assert P_pad == _round_up(P, 128)

    args = [x, params["w0"], params["b0"]]
    if num_hidden_layers > 0:                 # gate out zero-extent operands when L == 0
        args += [params["wh"], params["bh"]]
    args += [params["w_out"], params["b_out"]]

    out_shape = jax.ShapeDtypeStruct((B, P_pad), jnp.float32)

    # Padded-byte VMEM residency guard + explicit scoped-VMEM limit,
    # generation aware (v5e 16 MiB scoped default, v7x 64 MiB per-TC VMEM).
    padded = sum(_padded_vmem_bytes(a.shape, a.dtype) for a in args)
    padded += _padded_vmem_bytes(out_shape.shape, out_shape.dtype)
    padded += 4 * _padded_vmem_bytes((B, H), jnp.float32)   # live activation slack
    try:
        vmem_capacity = int(pltpu.get_tpu_info().vmem_capacity_bytes)
    except Exception:  # fall back to the smallest per-TC VMEM (v7x)
        vmem_capacity = 64 * 1024 * 1024
    budget = vmem_capacity - 16 * 1024 * 1024
    assert padded <= budget, (
        f"fused FrameGenerator kernel needs ~{padded} padded VMEM bytes, budget "
        f"is {budget}; tile over output pixels / layers instead of fusing")
    vmem_limit = int(min(vmem_capacity,
                         max(32 * 1024 * 1024, 2 * padded + (4 << 20))))

    vmem_spec = pl.BlockSpec(memory_space=pltpu.MemorySpace.VMEM)
    out_flat = pl.pallas_call(
        functools.partial(frame_generator_kernel,
                          num_hidden_layers=num_hidden_layers),
        out_shape=out_shape,
        in_specs=[vmem_spec] * len(args),
        out_specs=vmem_spec,
        compiler_params=pltpu.CompilerParams(vmem_limit_bytes=vmem_limit),
    )(*args)

    return out_flat[:, :P].reshape(B, output_size[0], output_size[1])


# ----------------------------------------------------------------------------
# Parameter construction: PyTorch-style uniform init + BN running stats, with
# BN scale/shift folded forward into the next Linear (host-side).  Hidden
# weights are packed into a lane-dense (H, L*H) bf16 slab, hidden biases into
# a (1, L*H) f32 slab, and the output layer is lane-padded to a multiple of 128.
# Returns (kernel_params, raw_params) so fold correctness can be checked.
# ----------------------------------------------------------------------------
def make_params(key, input_size, hidden, output_size, num_hidden_layers,
                weight_dtype=jnp.bfloat16):
    P = output_size[0] * output_size[1]
    P_pad = _round_up(P, 128)
    keys = iter(jax.random.split(key, 8 * (num_hidden_layers + 2)))

    def linear(fan_in, fan_out):
        bound = 1.0 / float(fan_in) ** 0.5
        w = jax.random.uniform(next(keys), (fan_in, fan_out), jnp.float32, -bound, bound)
        b = jax.random.uniform(next(keys), (1, fan_out), jnp.float32, -bound, bound)
        return w, b

    def bn_fold(features):
        gamma = jax.random.uniform(next(keys), (1, features), jnp.float32, 0.5, 1.5)
        beta = jax.random.uniform(next(keys), (1, features), jnp.float32, -0.5, 0.5)
        mean = jax.random.uniform(next(keys), (1, features), jnp.float32, -0.2, 0.2)
        var = jax.random.uniform(next(keys), (1, features), jnp.float32, 0.5, 1.5)
        scale = gamma / jnp.sqrt(var + BN_EPS)
        shift = beta - mean * scale
        return scale, shift

    w0, b0 = linear(input_size, hidden)
    s0, t0 = bn_fold(hidden)
    raw = {"w0": w0, "b0": b0, "s0": s0, "t0": t0,
           "wh": [], "bh": [], "sh": [], "th": []}

    cur_s, cur_t = s0, t0            # BN of the previous layer, to be folded in
    wh_cols, bh_cols = [], []
    for _ in range(num_hidden_layers):
        w, b = linear(hidden, hidden)
        s, t = bn_fold(hidden)
        raw["wh"].append(w); raw["bh"].append(b)
        raw["sh"].append(s); raw["th"].append(t)
        wh_cols.append(cur_s.reshape(hidden, 1) * w)    # diag(s_prev) @ W
        bh_cols.append(cur_t @ w + b)                   # t_prev @ W + b
        cur_s, cur_t = s, t

    w_out, b_out = linear(hidden, P)
    raw["w_out"], raw["b_out"] = w_out, b_out
    w_out_f = cur_s.reshape(hidden, 1) * w_out
    b_out_f = cur_t @ w_out + b_out
    if P_pad != P:  # keep the output store lane-dense (unmasked vst)
        w_out_f = jnp.pad(w_out_f, ((0, 0), (0, P_pad - P)))
        b_out_f = jnp.pad(b_out_f, ((0, 0), (0, P_pad - P)))

    kernel_params = {"w0": w0, "b0": b0,
                     "w_out": w_out_f.astype(weight_dtype),
                     "b_out": b_out_f}
    if num_hidden_layers > 0:
        kernel_params["wh"] = jnp.concatenate(wh_cols, axis=1).astype(weight_dtype)
        kernel_params["bh"] = jnp.concatenate(bh_cols, axis=1)
    return kernel_params, raw


# ----------------------------------------------------------------------------
# Pure-JAX reference (unfolded f32 math, HIGHEST precision) for correctness.
# ----------------------------------------------------------------------------
def reference_forward(x, raw, output_size, num_hidden_layers):
    hp = jax.lax.Precision.HIGHEST
    h = jnp.dot(x, raw["w0"], precision=hp) + raw["b0"]
    h = jnp.where(h > 0, h, NEG_SLOPE * h)
    h = h * raw["s0"] + raw["t0"]
    for i in range(num_hidden_layers):
        h = jnp.dot(h, raw["wh"][i], precision=hp) + raw["bh"][i]
        h = jnp.where(h > 0, h, NEG_SLOPE * h)
        h = h * raw["sh"][i] + raw["th"][i]
    z = jnp.dot(h, raw["w_out"], precision=hp) + raw["b_out"]
    return jax.nn.sigmoid(z).reshape(-1, output_size[0], output_size[1])


if __name__ == "__main__":
    # Small, module-consistent shapes:
    #   input_size=1, hidden_layer_size=32, output_size=(16, 24),
    #   num_hidden_layers=4, batch=8.   (16*24 = 384 = 3*128 -> lane-dense store)
    INPUT_SIZE = 1
    HIDDEN = 32
    OUTPUT_SIZE = (16, 24)
    NUM_HIDDEN_LAYERS = 4
    BATCH = 8

    key = jax.random.PRNGKey(0)
    k_params, k_x = jax.random.split(key)
    params, raw = make_params(k_params, INPUT_SIZE, HIDDEN, OUTPUT_SIZE,
                              NUM_HIDDEN_LAYERS)
    x = jax.random.normal(k_x, (BATCH, INPUT_SIZE), jnp.float32)

    out = frame_generator_forward(x, params, OUTPUT_SIZE, NUM_HIDDEN_LAYERS)
    out = jax.block_until_ready(out)

    ref = reference_forward(x, raw, OUTPUT_SIZE, NUM_HIDDEN_LAYERS)

    assert out.shape == (BATCH, OUTPUT_SIZE[0], OUTPUT_SIZE[1])
    assert bool(jnp.all(jnp.isfinite(out)))
    assert bool(jnp.all((out >= 0.0) & (out <= 1.0)))              # sigmoid range
    # bf16 matmul weights -> looser tolerance than the old pure-f32 check;
    # a wrong BN fold would miss by far more than this.
    assert bool(jnp.allclose(out, ref, atol=3e-2, rtol=3e-2)), (
        "max abs diff vs reference: %f" % float(jnp.max(jnp.abs(out - ref))))
    print("KERNEL_OK")
</pallas_src>

<mosaic_0001>
module attributes {stable_mosaic.version = 11 : i64} {
  func.func @frame_generator_kernel(%arg0: memref<8x1xf32, #tpu.memory_space<vmem>>, %arg1: memref<1x32xf32, #tpu.memory_space<vmem>>, %arg2: memref<1x32xf32, #tpu.memory_space<vmem>>, %arg3: memref<32x128xbf16, #tpu.memory_space<vmem>>, %arg4: memref<1x128xf32, #tpu.memory_space<vmem>>, %arg5: memref<32x384xbf16, #tpu.memory_space<vmem>>, %arg6: memref<1x384xf32, #tpu.memory_space<vmem>>, %arg7: memref<8x384xf32, #tpu.memory_space<vmem>>) attributes {dimension_semantics = [], scalar_prefetch = 0 : i64, scratch_operands = 0 : i64, tpu.core_type = #tpu.core_type<tc>} {
    %c0 = arith.constant 0 : index
    %c0_0 = arith.constant 0 : index
    %0 = vector.load %arg0[%c0, %c0_0] : memref<8x1xf32, #tpu.memory_space<vmem>>, vector<8x1xf32>
    %c0_1 = arith.constant 0 : index
    %c0_2 = arith.constant 0 : index
    %1 = vector.load %arg1[%c0_1, %c0_2] : memref<1x32xf32, #tpu.memory_space<vmem>>, vector<1x32xf32>
    %2 = vector.broadcast %0 : vector<8x1xf32> to vector<8x32xf32>
    %3 = vector.broadcast %1 : vector<1x32xf32> to vector<8x32xf32>
    %4 = arith.mulf %2, %3 : vector<8x32xf32>
    %c0_3 = arith.constant 0 : index
    %c0_4 = arith.constant 0 : index
    %5 = vector.load %arg2[%c0_3, %c0_4] : memref<1x32xf32, #tpu.memory_space<vmem>>, vector<1x32xf32>
    %6 = vector.broadcast %5 : vector<1x32xf32> to vector<8x32xf32>
    %7 = arith.addf %4, %6 : vector<8x32xf32>
    %cst = arith.constant 0.00999999977 : f32
    %8 = vector.broadcast %cst : f32 to vector<8x32xf32>
    %9 = arith.mulf %8, %7 : vector<8x32xf32>
    %10 = arith.maximumf %7, %9 : vector<8x32xf32>
    %c0_5 = arith.constant 0 : index
    %c0_6 = arith.constant 0 : index
    %11 = vector.load %arg3[%c0_5, %c0_6] : memref<32x128xbf16, #tpu.memory_space<vmem>>, vector<32x32xbf16>
    %c0_7 = arith.constant 0 : index
    %c0_8 = arith.constant 0 : index
    %12 = vector.load %arg4[%c0_7, %c0_8] : memref<1x128xf32, #tpu.memory_space<vmem>>, vector<1x32xf32>
    %13 = arith.truncf %10 : vector<8x32xf32> to vector<8x32xbf16>
    %cst_9 = arith.constant dense<0.000000e+00> : vector<8x32xf32>
    %14 = tpu.matmul %13, %11, %cst_9 {dimension_numbers = #tpu.dot_dimension_numbers<[1], [0], [0], [1], [0, 0, 1, 1], [], []>} : vector<8x32xbf16>, vector<32x32xbf16>, vector<8x32xf32> -> vector<8x32xf32>
    %15 = vector.broadcast %12 : vector<1x32xf32> to vector<8x32xf32>
    %16 = arith.addf %14, %15 : vector<8x32xf32>
    %cst_10 = arith.constant 0.00999999977 : f32
    %17 = vector.broadcast %cst_10 : f32 to vector<8x32xf32>
    %18 = arith.mulf %17, %16 : vector<8x32xf32>
    %19 = arith.maximumf %16, %18 : vector<8x32xf32>
    %c0_11 = arith.constant 0 : index
    %c32 = arith.constant 32 : index
    %20 = vector.load %arg3[%c0_11, %c32] : memref<32x128xbf16, #tpu.memory_space<vmem>>, vector<32x32xbf16>
    %c0_12 = arith.constant 0 : index
    %c32_13 = arith.constant 32 : index
    %21 = vector.load %arg4[%c0_12, %c32_13] : memref<1x128xf32, #tpu.memory_space<vmem>>, vector<1x32xf32>
    %22 = arith.truncf %19 : vector<8x32xf32> to vector<8x32xbf16>
    %cst_14 = arith.constant dense<0.000000e+00> : vector<8x32xf32>
    %23 = tpu.matmul %22, %20, %cst_14 {dimension_numbers = #tpu.dot_dimension_numbers<[1], [0], [0], [1], [0, 0, 1, 1], [], []>} : vector<8x32xbf16>, vector<32x32xbf16>, vector<8x32xf32> -> vector<8x32xf32>
    %24 = vector.broadcast %21 : vector<1x32xf32> to vector<8x32xf32>
    %25 = arith.addf %23, %24 : vector<8x32xf32>
    %cst_15 = arith.constant 0.00999999977 : f32
    %26 = vector.broadcast %cst_15 : f32 to vector<8x32xf32>
    %27 = arith.mulf %26, %25 : vector<8x32xf32>
    %28 = arith.maximumf %25, %27 : vector<8x32xf32>
    %c0_16 = arith.constant 0 : index
    %c64 = arith.constant 64 : index
    %29 = vector.load %arg3[%c0_16, %c64] : memref<32x128xbf16, #tpu.memory_space<vmem>>, vector<32x32xbf16>
    %c0_17 = arith.constant 0 : index
    %c64_18 = arith.constant 64 : index
    %30 = vector.load %arg4[%c0_17, %c64_18] : memref<1x128xf32, #tpu.memory_space<vmem>>, vector<1x32xf32>
    %31 = arith.truncf %28 : vector<8x32xf32> to vector<8x32xbf16>
    %cst_19 = arith.constant dense<0.000000e+00> : vector<8x32xf32>
    %32 = tpu.matmul %31, %29, %cst_19 {dimension_numbers = #tpu.dot_dimension_numbers<[1], [0], [0], [1], [0, 0, 1, 1], [], []>} : vector<8x32xbf16>, vector<32x32xbf16>, vector<8x32xf32> -> vector<8x32xf32>
    %33 = vector.broadcast %30 : vector<1x32xf32> to vector<8x32xf32>
    %34 = arith.addf %32, %33 : vector<8x32xf32>
    %cst_20 = arith.constant 0.00999999977 : f32
    %35 = vector.broadcast %cst_20 : f32 to vector<8x32xf32>
    %36 = arith.mulf %35, %34 : vector<8x32xf32>
    %37 = arith.maximumf %34, %36 : vector<8x32xf32>
    %c0_21 = arith.constant 0 : index
    %c96 = arith.constant 96 : index
    %38 = vector.load %arg3[%c0_21, %c96] : memref<32x128xbf16, #tpu.memory_space<vmem>>, vector<32x32xbf16>
    %c0_22 = arith.constant 0 : index
    %c96_23 = arith.constant 96 : index
    %39 = vector.load %arg4[%c0_22, %c96_23] : memref<1x128xf32, #tpu.memory_space<vmem>>, vector<1x32xf32>
    %40 = arith.truncf %37 : vector<8x32xf32> to vector<8x32xbf16>
    %cst_24 = arith.constant dense<0.000000e+00> : vector<8x32xf32>
    %41 = tpu.matmul %40, %38, %cst_24 {dimension_numbers = #tpu.dot_dimension_numbers<[1], [0], [0], [1], [0, 0, 1, 1], [], []>} : vector<8x32xbf16>, vector<32x32xbf16>, vector<8x32xf32> -> vector<8x32xf32>
    %42 = vector.broadcast %39 : vector<1x32xf32> to vector<8x32xf32>
    %43 = arith.addf %41, %42 : vector<8x32xf32>
    %cst_25 = arith.constant 0.00999999977 : f32
    %44 = vector.broadcast %cst_25 : f32 to vector<8x32xf32>
    %45 = arith.mulf %44, %43 : vector<8x32xf32>
    %46 = arith.maximumf %43, %45 : vector<8x32xf32>
    %47 = arith.truncf %46 : vector<8x32xf32> to vector<8x32xbf16>
    %c0_26 = arith.constant 0 : index
    %c0_27 = arith.constant 0 : index
    %48 = vector.load %arg5[%c0_26, %c0_27] : memref<32x384xbf16, #tpu.memory_space<vmem>>, vector<32x384xbf16>
    %cst_28 = arith.constant dense<0.000000e+00> : vector<8x384xf32>
    %49 = tpu.matmul %47, %48, %cst_28 {dimension_numbers = #tpu.dot_dimension_numbers<[1], [0], [0], [1], [0, 0, 1, 1], [], []>} : vector<8x32xbf16>, vector<32x384xbf16>, vector<8x384xf32> -> vector<8x384xf32>
    %c0_29 = arith.constant 0 : index
    %c0_30 = arith.constant 0 : index
    %50 = vector.load %arg6[%c0_29, %c0_30] : memref<1x384xf32, #tpu.memory_space<vmem>>, vector<1x384xf32>
    %51 = vector.broadcast %50 : vector<1x384xf32> to vector<8x384xf32>
    %52 = arith.addf %49, %51 : vector<8x384xf32>
    %53 = arith.negf %52 : vector<8x384xf32>
    %54 = math.exp %53 : vector<8x384xf32>
    %cst_31 = arith.constant 1.000000e+00 : f32
    %55 = vector.broadcast %cst_31 : f32 to vector<8x384xf32>
    %56 = arith.addf %55, %54 : vector<8x384xf32>
    %57 = arith.divf %55, %56 : vector<8x384xf32>
    %c0_32 = arith.constant 0 : index
    %c0_33 = arith.constant 0 : index
    %58 = vector.load %arg7[%c0_32, %c0_33] : memref<8x384xf32, #tpu.memory_space<vmem>>, vector<8x384xf32>
    tpu.vector_store %arg7[%c0_32, %c0_33], %57 {strides = array<i32>} : memref<8x384xf32, #tpu.memory_space<vmem>>, vector<8x384xf32>,
    return
  }
}

</mosaic_0001>

<bundles_post_ra>
// kernel: tpu_custom_call.1
= control target key start
LH: loop header
LB: loop body
LE: loop exit
PB: predicated region body
PF: predicated region fallthrough
CT: control target
= control target key end

     0   :  { %12 = vsyncpa [#allocation3], 0  ;;  %s779_s0 = inlined_call_operand.vmem [shape: f32[8,1], index: 0, kind: input, shape index: {}]   ;;  %s780_s1 = inlined_call_operand.vmem [shape: f32[1,32], index: 1, kind: input, shape index: {}]   ;;  %s781_s2 = inlined_call_operand.vmem [shape: f32[1,32], index: 2, kind: input, shape index: {}]   ;;  %s782_s3 = inlined_call_operand.hbm [shape: bf16[32,128], index: 3, kind: input, shape index: {}]   ;;  %s783_s4 = inlined_call_operand.vmem [shape: f32[1,128], index: 4, kind: input, shape index: {}]   ;;  %s784_s5 = inlined_call_operand.hbm [shape: bf16[32,384], index: 5, kind: input, shape index: {}]   ;;  %s785_s6 = inlined_call_operand.vmem [shape: f32[1,384], index: 6, kind: input, shape index: {}]   ;;  %s786_s7 = inlined_call_operand.hbm [shape: f32[8,384], index: 7, kind: output, shape index: {}]  }
   0x1   :  { %13 = vsyncpa [#allocation6], 0 }
   0x2   :  { %14 = vsyncpa [#allocation4], 0  ;;  %s670_s24 = smov [#allocation2]  }
   0x3   :  { %s26_s25 = sshll.u32 %s670_s24, 4  ;;  %s27_s25 = int_to_ptr.vmem [resolvable:$true] %s26_s25 }
   0x4   :  { %s612_s26 = scalar_lea.vmem %s27_s25, 256  ;;  %p617_p1 = scmp.lt.s32.totalorder %s27_s25, %s27_s25 }
   0x5   :  { %p613_p0 = scmp.ne.s32.totalorder %s27_s25, %s612_s26  ;;  %p618_p2 = scmp.lt.s32.totalorder %s612_s26, %s612_s26 }
   0x7   :  { %p619_p3 = por %p618_p2, %p617_p1 }
   0x9   :  { %p620_p4 = pnand %p619_p3, %p613_p0 }
   0xb   :  { %623 = shalt.err (!%p620_p4)
}
   0xc   :  { %s671_s27 = smov 64   ;;  %s672_s28 = smov 4  }
   0xd   :  { %32 = dma.hbm_to_vmem [thread:$0]  %s782_s3, 256, %s27_s25, [#allocation3], %s671_s27, %s671_s27, %s672_s28  }
   0xe   :  { %s673_s8 = smov [#allocation5]  }
   0xf   :  { %s40_s9 = sshll.u32 %s673_s8, 4  ;;  %s41_s9 = int_to_ptr.vmem [resolvable:$true] %s40_s9 }
  0x10   :  { %s632_s10 = scalar_lea.vmem %s41_s9, 768  ;;  %p637_p6 = scmp.lt.s32.totalorder %s41_s9, %s41_s9 }
  0x11   :  { %p633_p5 = scmp.ne.s32.totalorder %s41_s9, %s632_s10  ;;  %p638_p7 = scmp.lt.s32.totalorder %s632_s10, %s632_s10 }
  0x13   :  { %p639_p8 = por %p638_p7, %p637_p6 }
  0x15   :  { %p640_p9 = pnand %p639_p8, %p633_p5 }
  0x17   :  { %643 = shalt.err (!%p640_p9)
}
  0x18   :  { %s674_s11 = smov 192   ;;  %s675_s12 = smov 12  }
  0x19   :  { %46 = dma.hbm_to_vmem [thread:$0]  %s784_s5, 768, %s41_s9, [#allocation6], %s674_s11, %s674_s11, %s675_s12  }
  0x1a   :  { %664 = dma.done.wait [#allocation3], 256  }
  0x1b   :  { %665 = vsyncadd [#allocation3], 4294967040 }
  0x1c   :  { %666 = dma.done.wait [#allocation6], 768  }
  0x1d   :  { %667 = vsyncadd [#allocation6], 4294966528  ;;  %v676_v0 = vmov 0   ;;  %v677_v1 = vmov 0.0   ;;  %v56_v2 = vld [vmem:[%s779_s0] sm:$0xff]  ;;  %v582_v3 = vld [vmem:[#allocation2 + $0x8] sm:$0xff]   ;;  %v326_v61 = vlaneseq }
  0x1e   :  { %581 = vset.pattern.permute.xlu0 %v676_v0  ;;  %529 = vmatprep.subr.bf16.mxu0 %v677_v1  ;;  %v583_v4 = vld [vmem:[#allocation2] sm:$0xff]   ;;  %vm678_vm0 = vmmov 0   ;;  %s679_s5 = smov 96   ;;  %vm104_vm1 = vcmask 261120   ;;  %v586_v46 = vld [vmem:[#allocation5 + $0x1c] ss:$12 sps:$4 sm:$0xff]  }
  0x1f   :  { %537 = vmatprep.subr.bf16.mxu1 %v677_v1  ;;  %60 = vperm.xlu0 %581, %v56_v2   ;;  %v496_v5 = vld [vmem:[%s783_s4] ss:$0 sm:$0xff]  ;;  %v584_v47 = vld [vmem:[#allocation5 + $0x18] ss:$12 sps:$4 sm:$0xff]   ;;  %v587_v48 = vld [vmem:[#allocation5 + $0x20] ss:$12 sps:$4 sm:$0xff]  }
  0x20   :  { %530 = vmatpush3.bf16.msra.mxu0 %v582_v3  ;;  %533 = vmatprep.mubr.msk.bf16.mxu0 %vm678_vm0, %v677_v1  ;;  %v494_v6 = vld [vmem:[%s780_s1] ss:$0 sm:$0xff]  ;;  %s680_s1 = smov 32   ;;  %v588_v50 = vld [vmem:[#allocation5] ss:$12 sps:$4 sm:$0xff]   ;;  %v327_v62 = vshrl.u32 %v326_v61, 7 }
  0x21   :  { %531 = vmatprep.subr.bf16.mxu0 %v677_v1  ;;  %541 = vmatprep.mubr.msk.bf16.mxu1 %vm678_vm0, %v677_v1  ;;  %v495_v7 = vld [vmem:[%s781_s2] ss:$0 sm:$0xff]  ;;  %v591_v51 = vld [vmem:[#allocation5 + $0x8] ss:$12 sps:$4 sm:$0xff]  }
  0x22   :  { %151 = vrot.lane.b32.xlu1 %v583_v4, %s679_s5  ;;  %v590_v49 = vld [vmem:[#allocation5 + $0x4] ss:$12 sps:$4 sm:$0xff]   ;;  %v328_v63 = vsub.s32 0, %v327_v62  ;;  %v332_v2 = vsub.s32 1, %v327_v62 }
  0x23   :  { %153 = vrot.lane.b32.xlu0 %v582_v3, %s679_s5 }
  0x24   :  { %532 = vmatpush3.bf16.msra.mxu0 %v583_v4 }
  0x25   :  { %545 = vmatprep.subr.bf16.mxu0 %v677_v1 }
  0x26   :  { %157 = vrot.lane.b32.xlu1 %v496_v5, %s679_s5 }
  0x27   :  { %208 = vrot.lane.b32.xlu0 %v582_v3, %s671_s27 }
  0x2a   :  { %206 = vrot.lane.b32.xlu1 %v583_v4, %s671_s27 }
  0x2b   :  { %212 = vrot.lane.b32.xlu0 %v496_v5, %s671_s27 }
  0x2e   :  { %263 = vrot.lane.b32.xlu1 %v582_v3, %s680_s1 }
  0x2f   :  { %261 = vrot.lane.b32.xlu0 %v583_v4, %s680_s1 }
  0x32   :  { %267 = vrot.lane.b32.xlu1 %v496_v5, %s680_s1 }
  0x94   :  { %v152_v15 = vpop.permute.xlu1 %151 }
  0x98   :  { %v158_v24 = vpop.permute.xlu1 %157 }
  0x9a   :  { %v61_v8 = vpop.permute.xlu0 %60 }
  0x9b   :  { %v69_v9 = vmul.f32 %v494_v6, %v61_v8 }
  0x9c   :  { %v207_v26 = vpop.permute.xlu1 %206 }
  0x9d   :  { %v77_v10 = vadd.f32 %v495_v7, %v69_v9 }
  0x9e   :  { %v154_v14 = vpop.permute.xlu0 %153 }
  0x9f   :  { %v78_v11 = vmul.f32 0.01, %v77_v10  ;;  %538 = vmatpush3.bf16.msra.mxu1 %v154_v14 }
  0xa0   :  { %539 = vmatprep.subr.bf16.mxu1 %v677_v1  ;;  %v264_v27 = vpop.permute.xlu1 %263 }
  0xa1   :  { %v79_v12 = vmax.f32 %v77_v10, %v78_v11 }
  0xa2   :  { %v209_v25 = vpop.permute.xlu0 %208 }
  0xa3   :  { %v85_v13 = vpack.c.bf16 %v79_v12, %v79_v12  ;;  %540 = vmatpush3.bf16.msra.mxu1 %v152_v15 }
  0xa4   :  { %553 = vmatprep.subr.bf16.mxu1 %v677_v1  ;;  %v268_v52 = vpop.permute.xlu1 %267 }
  0xa5   :  { %534 = vmatmul.mubr.msk.bf16.vlgmr.msra.gmra.mxu0 %vm104_vm1, %v85_v13 }
  0xa6   :  { %549 = vmatprep.mubr.msk.bf16.mxu0 %vm678_vm0, %v677_v1  ;;  %546 = vmatpush3.bf16.msra.mxu0 %v209_v25  ;;  %v213_v36 = vpop.permute.xlu0 %212 }
  0xa7   :  { %547 = vmatprep.subr.bf16.mxu0 %v677_v1 }
  0xaa   :  { %548 = vmatpush3.bf16.msra.mxu0 %v207_v26  ;;  %v262_v37 = vpop.permute.xlu0 %261 }
  0xab   :  { %388 = vmatprep.subr.bf16.mxu0 %v586_v46 }
 0x165   :  { %v142_v16 = vpop.f32.mrf.mxu0 }
 0x166   :  { %v143_v17 = vadd.f32 %v496_v5, %v142_v16 }
 0x167   :  { %v535_v18 = vpop.f32.mrf.mxu0 }
 0x168   :  { %v148_v19 = vmul.f32 0.01, %v143_v17 }
 0x169   :  { %v145_v20 = vpop.f32.mrf.mxu0 }
 0x16a   :  { %v149_v21 = vmax.f32 %v143_v17, %v148_v19 }
 0x16b   :  { %v536_v22 = vpop.f32.mrf.mxu0 }
 0x16c   :  { %v150_v23 = vpack.c.bf16 %v149_v21, %v149_v21 }
 0x16e   :  { %542 = vmatmul.mubr.msk.bf16.vlgmr.msra.gmra.mxu1 %vm104_vm1, %v150_v23 }
 0x16f   :  { %557 = vmatprep.mubr.msk.bf16.mxu1 %vm678_vm0, %v677_v1  ;;  %554 = vmatpush3.bf16.msra.mxu1 %v264_v27 }
 0x170   :  { %555 = vmatprep.subr.bf16.mxu1 %v677_v1 }
 0x173   :  { %556 = vmatpush3.bf16.msra.mxu1 %v262_v37 }
 0x174   :  { %561 = vmatprep.subr.bf16.mxu1 %v677_v1 }
 0x22e   :  { %v197_v28 = vpop.f32.mrf.mxu1 }
 0x22f   :  { %v198_v29 = vadd.f32 %v197_v28, %v158_v24 }
 0x230   :  { %v543_v30 = vpop.f32.mrf.mxu1 }
 0x231   :  { %v203_v31 = vmul.f32 0.01, %v198_v29 }
 0x232   :  { %v200_v32 = vpop.f32.mrf.mxu1 }
 0x233   :  { %v204_v33 = vmax.f32 %v198_v29, %v203_v31 }
 0x234   :  { %v544_v34 = vpop.f32.mrf.mxu1 }
 0x235   :  { %v205_v35 = vpack.c.bf16 %v204_v33, %v204_v33 }
 0x237   :  { %550 = vmatmul.mubr.msk.bf16.vlgmr.msra.gmra.mxu0 %vm104_vm1, %v205_v35 }
 0x238   :  { %408 = vmatprep.mubr.bf16.mxu0 %v676_v0  ;;  %389 = vmatpush1.bf16.msra.mxu0 %v584_v47  ;;  %v336_v0 = vsub.s32 2, %v327_v62 }
 0x239   :  { %390 = vmatprep.subr.bf16.mxu0 %v590_v49 }
 0x23c   :  { %391 = vmatpush1.bf16.msra.mxu0 %v588_v50 }
 0x2f7   :  { %v252_v38 = vpop.f32.mrf.mxu0 }
 0x2f8   :  { %v253_v39 = vadd.f32 %v252_v38, %v213_v36 }
 0x2f9   :  { %v551_v40 = vpop.f32.mrf.mxu0 }
 0x2fa   :  { %v258_v41 = vmul.f32 0.01, %v253_v39 }
 0x2fb   :  { %v255_v42 = vpop.f32.mrf.mxu0 }
 0x2fc   :  { %v259_v43 = vmax.f32 %v253_v39, %v258_v41 }
 0x2fd   :  { %v552_v44 = vpop.f32.mrf.mxu0 }
 0x2fe   :  { %v260_v45 = vpack.c.bf16 %v259_v43, %v259_v43 }
 0x300   :  { %558 = vmatmul.mubr.msk.bf16.vlgmr.msra.gmra.mxu1 %vm104_vm1, %v260_v45 }
 0x301   :  { %565 = vmatprep.mubr.msk.bf16.mxu1 %vm678_vm0, %v677_v1  ;;  %562 = vmatpush3.bf16.msra.mxu1 %v587_v48 }
 0x302   :  { %563 = vmatprep.subr.bf16.mxu1 %v677_v1  ;;  %v324_v1 = vld [vmem:[%s785_s6] sm:$0x7]  ;;  %s681_s6 = smov [#allocation7]  }
 0x303   :  { %v329_v3 = vrot.slane %v324_v1, %v328_v63  ;;  %v337_v4 = vrot.slane %v324_v1, %v336_v0  ;;  %v333_v5 = vrot.slane %v324_v1, %v332_v2  ;;  %s484_s21 = sshll.u32 %s681_s6, 4  ;;  %s485_s21 = int_to_ptr.vmem [resolvable:$true] %s484_s21 }
 0x304   :  { %s644_s22 = scalar_lea.vmem %s485_s21, 384  ;;  %p649_p11 = scmp.lt.s32.totalorder %s485_s21, %s485_s21 }
 0x305   :  { %564 = vmatpush3.bf16.msra.mxu1 %v591_v51  ;;  %p645_p10 = scmp.ne.s32.totalorder %s485_s21, %s644_s22  ;;  %p650_p12 = scmp.lt.s32.totalorder %s644_s22, %s644_s22 }
 0x307   :  { %p651_p13 = por %p650_p12, %p649_p11 }
 0x309   :  { %p652_p0 = pnand %p651_p13, %p645_p10 }
 0x3c0   :  { %v307_v53 = vpop.f32.mrf.mxu1 }
 0x3c1   :  { %v308_v54 = vadd.f32 %v307_v53, %v268_v52 }
 0x3c2   :  { %v559_v55 = vpop.f32.mrf.mxu1 }
 0x3c3   :  { %v313_v56 = vmul.f32 0.01, %v308_v54 }
 0x3c4   :  { %v310_v57 = vpop.f32.mrf.mxu1 }
 0x3c5   :  { %v314_v58 = vmax.f32 %v308_v54, %v313_v56 }
 0x3c6   :  { %v560_v59 = vpop.f32.mrf.mxu1 }
 0x3c7   :  { %v315_v60 = vpack.c.bf16 %v314_v58, %v314_v58 }
 0x3c9   :  { %509 = vmatmul.mubr.msk.bf16.vlgmr.msra.gmra.mxu0 %vm104_vm1, %v315_v60  ;;  %566 = vmatmul.mubr.msk.bf16.vlgmr.msra.gmra.mxu1 %vm104_vm1, %v315_v60 }
 0x489   :  { %v410_v6 = vpop.f32.mrf.mxu0  ;;  %v451_v7 = vpop.f32.mrf.mxu1 }
 0x48a   :  { %v411_v8 = vadd.f32 %v410_v6, %v329_v3  ;;  %v452_v9 = vadd.f32 %v451_v7, %v337_v4 }
 0x48b   :  { %v412_v10 = vpop.f32.mrf.mxu0  ;;  %v567_v11 = vpop.f32.mrf.mxu1 }
 0x48c   :  { %v511_v12 = vmul.f32 -1.442695, %v411_v8  ;;  %v513_v13 = vmul.f32 -1.442695, %v452_v9  ;;  %v413_v14 = vadd.f32 %v412_v10, %v333_v5 }
 0x48d   :  { %v414_v15 = vpop.f32.mrf.mxu0  ;;  %v454_v16 = vpop.f32.mrf.mxu1 }
 0x48e   :  { %592 = vpow2.f32 %v511_v12  ;;  %v512_v17 = vmul.f32 -1.442695, %v413_v14 }
 0x48f   :  { %594 = vpow2.f32 %v513_v13  ;;  %v415_v18 = vpop.f32.mrf.mxu0  ;;  %v568_v19 = vpop.f32.mrf.mxu1 }
 0x490   :  { %596 = vpow2.f32 %v512_v17 }
 0x49b   :  { %v593_v20 = vpop.eup %592 }
 0x49c   :  { %v595_v21 = vpop.eup %594  ;;  %v466_v22 = vadd.f32 1.0, %v593_v20 }
 0x49d   :  { %v597_v23 = vpop.eup %596  ;;  %v468_v24 = vadd.f32 1.0, %v595_v21 }
 0x49e   :  { %598 = vrcp.f32 %v466_v22  ;;  %v467_v25 = vadd.f32 1.0, %v597_v23 }
 0x49f   :  { %600 = vrcp.f32 %v468_v24 }
 0x4a0   :  { %602 = vrcp.f32 %v467_v25 }
 0x4ab   :  { %v599_v26 = vpop.eup %598 }
 0x4ac   :  { %v601_v27 = vpop.eup %600  ;;  %475 = vst [vmem:[#allocation7] sm:$0xff] %v599_v26 }
 0x4ad   :  { %v603_v28 = vpop.eup %602  ;;  %477 = vst [vmem:[#allocation7 + $0x10] sm:$0xff] %v601_v27 }
 0x4ae   :  { %476 = vst [vmem:[#allocation7 + $0x8] sm:$0xff] %v603_v28 }
 0x4af   :  { %655 = shalt.err (!%p652_p0)
}
 0x4b0   :  { %487 = dma.vmem_to_hbm [thread:$0]  %s485_s21, 384, %s786_s7, [#allocation4]  }
 0x4b1   :  { %668 = dma.done.wait [#allocation4], 384  }
 0x4b2   :  { %669 = vsyncadd [#allocation4], 4294966912 }
 0x4b3   :  { %491 = vsyncpa [#allocation3], 1 }
 0x4b4   :  { %492 = vsyncpa [#allocation6], 1 }
 0x4b5   :  { %493 = vsyncpa [#allocation4], 1 }

</bundles_post_ra>
